<compile_context>
chip_gen: v7x
topology: tpu7x:2x2x1
jax: 0.10.0
libtpu: 0.0.40
codegen_flags: <defaults>
</compile_context>

<pallas_src>
import functools

import jax
import jax.numpy as jnp
from jax.experimental import pallas as pl
from jax.experimental.pallas import tpu as pltpu

_ACT_DTYPE = jnp.bfloat16      # inter-layer activation storage (halves traffic)


# ---------------------------------------------------------------------------
# Pallas kernels
# ---------------------------------------------------------------------------
def _matmul_bnstats_kernel(p_ref, w_ref, y_ref, sum_ref, ssq_ref, acc_ref):
    """Grid (Nt, G, Mt, Kt): bf16 matmul, f32 accum, fused per-channel stats."""
    g = pl.program_id(1)
    i = pl.program_id(2)
    k = pl.program_id(3)
    nk = pl.num_programs(3)

    @pl.when(k == 0)
    def _():
        acc_ref[...] = jnp.zeros_like(acc_ref)

    @pl.when(jnp.logical_and(jnp.logical_and(g == 0, i == 0), k == 0))
    def _():
        sum_ref[...] = jnp.zeros_like(sum_ref)
        ssq_ref[...] = jnp.zeros_like(ssq_ref)

    acc_ref[...] += jnp.dot(p_ref[0, :, :], w_ref[0, :, :],
                            preferred_element_type=jnp.float32)

    @pl.when(k == nk - 1)
    def _():
        y = acc_ref[...]
        y_ref[0, :, :] = y
        # exact per-channel batch statistics (padded rows are all-zero)
        sum_ref[...] += jnp.sum(y, axis=0, keepdims=True)
        ssq_ref[...] += jnp.sum(y * y, axis=0, keepdims=True)


def _matmul_tanh_kernel(p_ref, w_ref, o_ref, acc_ref):
    """Grid (G, Mt, Nt, Kt): bf16 matmul, f32 accum, tanh epilogue."""
    k = pl.program_id(3)

    @pl.when(k == 0)
    def _():
        acc_ref[...] = jnp.zeros_like(acc_ref)

    acc_ref[...] += jnp.dot(p_ref[0, :, :], w_ref[0, :, :],
                            preferred_element_type=jnp.float32)

    @pl.when(k == pl.num_programs(3) - 1)
    def _():
        o_ref[0, :, :] = jnp.tanh(acc_ref[...]).astype(o_ref.dtype)


def _bn_relu_kernel(y_ref, scale_ref, shift_ref, o_ref):
    """Elementwise second BN pass: out = relu(y*scale + shift), cast to bf16."""
    o_ref[...] = jnp.maximum(
        y_ref[...] * scale_ref[...] + shift_ref[...], 0.0).astype(o_ref.dtype)


# ---------------------------------------------------------------------------
# pallas_call wrappers
# ---------------------------------------------------------------------------
def _round_up(x, m):
    return (x + m - 1) // m * m


def _plan(m, k, n):
    """Tile sizes + padded operand sizes for a grouped (m,k)@(k,n) matmul."""
    tm = min(256, _round_up(max(m, 16), 16))
    mp = _round_up(m, tm)
    tn = 128
    np_ = _round_up(n, tn)
    kp = _round_up(max(k, 128), 128)
    if kp % 512 == 0:
        tk = 512
    elif kp % 256 == 0:
        tk = 256
    else:
        tk = 128
    return tm, tk, tn, mp, kp, np_


def _pad_to(x, shape):
    return jnp.pad(x, [(0, t - s) for s, t in zip(x.shape, shape)])


def _matmul_bn_stats(patches, wmat, tm, tk, tn):
    G, Mp, Kp = patches.shape
    Np = wmat.shape[2]
    grid = (Np // tn, G, Mp // tm, Kp // tk)
    return pl.pallas_call(
        _matmul_bnstats_kernel,
        out_shape=(jax.ShapeDtypeStruct((G, Mp, Np), jnp.float32),
                   jax.ShapeDtypeStruct((1, Np), jnp.float32),
                   jax.ShapeDtypeStruct((1, Np), jnp.float32)),
        grid=grid,
        in_specs=[
            pl.BlockSpec((1, tm, tk), lambda j, g, i, k: (g, i, k)),
            pl.BlockSpec((1, tk, tn), lambda j, g, i, k: (g, k, j)),
        ],
        out_specs=(
            pl.BlockSpec((1, tm, tn), lambda j, g, i, k: (g, i, j)),
            pl.BlockSpec((1, tn), lambda j, g, i, k: (0, j)),
            pl.BlockSpec((1, tn), lambda j, g, i, k: (0, j)),
        ),
        scratch_shapes=[pltpu.VMEM((tm, tn), jnp.float32)],
        compiler_params=pltpu.CompilerParams(
            dimension_semantics=("parallel", "arbitrary", "arbitrary",
                                 "arbitrary")),
    )(patches, wmat)


def _matmul_tanh(patches, wmat, tm, tk, tn):
    G, Mp, Kp = patches.shape
    Np = wmat.shape[2]
    grid = (G, Mp // tm, Np // tn, Kp // tk)
    return pl.pallas_call(
        _matmul_tanh_kernel,
        out_shape=jax.ShapeDtypeStruct((G, Mp, Np), jnp.float32),
        grid=grid,
        in_specs=[
            pl.BlockSpec((1, tm, tk), lambda g, i, j, k: (g, i, k)),
            pl.BlockSpec((1, tk, tn), lambda g, i, j, k: (g, k, j)),
        ],
        out_specs=pl.BlockSpec((1, tm, tn), lambda g, i, j, k: (g, i, j)),
        scratch_shapes=[pltpu.VMEM((tm, tn), jnp.float32)],
        compiler_params=pltpu.CompilerParams(
            dimension_semantics=("parallel", "parallel", "parallel",
                                 "arbitrary")),
    )(patches, wmat)


def _bn_relu_apply(y2d, scale, shift, tm, tn, out_dtype):
    Mp2, Np = y2d.shape
    return pl.pallas_call(
        _bn_relu_kernel,
        out_shape=jax.ShapeDtypeStruct((Mp2, Np), out_dtype),
        grid=(Mp2 // tm, Np // tn),
        in_specs=[
            pl.BlockSpec((tm, tn), lambda i, j: (i, j)),
            pl.BlockSpec((1, tn), lambda i, j: (0, j)),
            pl.BlockSpec((1, tn), lambda i, j: (0, j)),
        ],
        out_specs=pl.BlockSpec((tm, tn), lambda i, j: (i, j)),
        compiler_params=pltpu.CompilerParams(
            dimension_semantics=("parallel", "parallel")),
    )(y2d, scale, shift)


# ---------------------------------------------------------------------------
# Plain-JAX glue: ConvTranspose2d lowering (NHWC)
# ---------------------------------------------------------------------------
def _im2col_s1(x, k, pad):
    """stride-1 ConvTranspose2d == pad-by-(k-1-pad) conv with flipped kernel."""
    B, H, W, C = x.shape
    q = k - 1 - pad
    Ho, Wo = H + 2 * q - k + 1, W + 2 * q - k + 1
    xp = jnp.pad(x, ((0, 0), (q, q), (q, q), (0, 0)))
    cols = [xp[:, i:i + Ho, j:j + Wo, :] for i in range(k) for j in range(k)]
    patches = jnp.stack(cols, axis=-1)                   # (B,Ho,Wo,C,k*k)
    return patches.reshape(B * Ho * Wo, C * k * k), (B, Ho, Wo)


def _weight_matrix_s1(w):
    """(Cin,Cout,k,k) ConvTranspose2d weight -> (Cin*k*k, Cout), flipped."""
    Cin, Cout, kh, kw = w.shape
    wf = w[:, :, ::-1, ::-1]
    return wf.transpose(0, 2, 3, 1).reshape(Cin * kh * kw, Cout)


# k=4, s=2, p=1 transposed conv: kernel-row (col) indices for (parity, tap).
_TAP = ((3, 1), (2, 0))


def _subpixel_patches(x):
    """Per output-parity (2x2) patch matrices for a k=4,s=2,p=1 deconv."""
    B, H, W, C = x.shape
    xp = jnp.pad(x, ((0, 0), (1, 1), (1, 1), (0, 0)))
    groups = []
    for dy in (0, 1):
        for dx in (0, 1):
            taps = [xp[:, dy + a:dy + a + H, dx + b:dx + b + W, :]
                    for a in (0, 1) for b in (0, 1)]
            groups.append(jnp.stack(taps, axis=-1).reshape(B * H * W, C * 4))
    return jnp.stack(groups, axis=0), (B, H, W)          # (4, B*H*W, Cin*4)


def _subpixel_weights(w):
    """(Cin,Cout,4,4) -> (4, Cin*4, Cout), group g = dy*2 + dx."""
    Cin, Cout = w.shape[0], w.shape[1]
    groups = []
    for dy in (0, 1):
        for dx in (0, 1):
            ws = w[:, :, list(_TAP[dy]), :][:, :, :, list(_TAP[dx])]
            groups.append(ws.transpose(0, 2, 3, 1).reshape(Cin * 4, Cout))
    return jnp.stack(groups, axis=0)


def _interleave_parities(y4, B, H, W, C):
    """(4,B,H,W,C) with g = dy*2+dx  ->  (B, 2H, 2W, C)."""
    y = y4.reshape(2, 2, B, H, W, C).transpose(2, 3, 0, 4, 1, 5)
    return y.reshape(B, 2 * H, 2 * W, C)


# ---------------------------------------------------------------------------
# Layers
# ---------------------------------------------------------------------------
def _deconv_bn_relu_layer(x, cfg, w, gamma, beta, eps=1e-5):
    Cout = cfg["of"]
    if cfg["s"] == 2:
        patches, (B, H, W) = _subpixel_patches(x)
        wmat = _subpixel_weights(w)
    else:
        p2, (B, H, W) = _im2col_s1(x, cfg["k"], cfg["p"])   # (B,H,W)=output HW
        patches, wmat = p2[None], _weight_matrix_s1(w)[None]
    G, M, K = patches.shape
    tm, tk, tn, Mp, Kp, Np = _plan(M, K, Cout)
    patches = _pad_to(patches.astype(jnp.bfloat16), (G, Mp, Kp))
    wmat = _pad_to(wmat.astype(jnp.bfloat16), (G, Kp, Np))

    y, csum, csumsq = _matmul_bn_stats(patches, wmat, tm, tk, tn)

    # BatchNorm2d, training mode (biased variance) -- exact over all B*Ho*Wo.
    n = jnp.float32(G * M)
    mean = csum / n
    var = jnp.maximum(csumsq / n - mean * mean, 0.0)
    inv = jax.lax.rsqrt(var + eps)
    scale = _pad_to(gamma.reshape(1, -1).astype(jnp.float32), (1, Np)) * inv
    shift = _pad_to(beta.reshape(1, -1).astype(jnp.float32), (1, Np)) - mean * scale

    out = _bn_relu_apply(y.reshape(G * Mp, Np), scale, shift, tm, tn, _ACT_DTYPE)
    out = out.reshape(G, Mp, Np)[:, :M, :Cout]
    if cfg["s"] == 2:
        return _interleave_parities(out.reshape(4, B, H, W, Cout), B, H, W, Cout)
    return out.reshape(B, H, W, Cout)


def _deconv_tanh_layer(x, cfg, w):
    Cout = cfg["of"]
    patches, (B, H, W) = _subpixel_patches(x)     # final layer is k=4,s=2,p=1
    wmat = _subpixel_weights(w)
    G, M, K = patches.shape
    tm, tk, tn, Mp, Kp, Np = _plan(M, K, Cout)
    patches = _pad_to(patches.astype(jnp.bfloat16), (G, Mp, Kp))
    wmat = _pad_to(wmat.astype(jnp.bfloat16), (G, Kp, Np))
    y = _matmul_tanh(patches, wmat, tm, tk, tn)          # (4, Mp, Np) f32
    y = y[:, :M, :Cout].reshape(4, B, H, W, Cout)
    return _interleave_parities(y, B, H, W, Cout)


# ---------------------------------------------------------------------------
# DCGAN_G: architecture + deterministic parameter init (mirrors __init__)
# ---------------------------------------------------------------------------
def build_dcgan_g(key, isize, nz, nc, ngf, n_extra_layers=0):
    assert isize % 16 == 0, "isize has to be a multiple of 16"
    cngf, tisize = ngf // 2, 4
    while tisize != isize:
        cngf *= 2
        tisize *= 2

    configs = [dict(kind="deconv_bn_relu", inf=nz, of=cngf, k=4, s=1, p=0)]
    csize = 4
    while csize < isize // 2:
        configs.append(dict(kind="deconv_bn_relu", inf=cngf, of=cngf // 2,
                            k=4, s=2, p=1))
        cngf //= 2
        csize *= 2
    for _ in range(n_extra_layers):
        configs.append(dict(kind="deconv_bn_relu", inf=cngf, of=cngf,
                            k=3, s=1, p=1))
    configs.append(dict(kind="deconv_tanh", inf=cngf, of=nc, k=4, s=2, p=1))

    weights = []
    for cfg in configs:
        key, kw = jax.random.split(key)
        p = dict(w=0.02 * jax.random.normal(
            kw, (cfg["inf"], cfg["of"], cfg["k"], cfg["k"]), jnp.float32))
        if cfg["kind"] == "deconv_bn_relu":
            key, kg, kb = jax.random.split(key, 3)
            p["gamma"] = 1.0 + 0.02 * jax.random.normal(kg, (cfg["of"],), jnp.float32)
            p["beta"] = 0.02 * jax.random.normal(kb, (cfg["of"],), jnp.float32)
        weights.append(p)
    return configs, weights


def dcgan_g_forward(configs, weights, x):
    """x: (B, nz, 1, 1) NCHW float32 -> (B, nc, isize, isize) NCHW float32."""
    h = jnp.transpose(x, (0, 2, 3, 1))        # NHWC (lane-dense channel axis)
    for cfg, p in zip(configs, weights):
        if cfg["kind"] == "deconv_bn_relu":
            h = _deconv_bn_relu_layer(h, cfg, p["w"], p["gamma"], p["beta"])
        else:
            h = _deconv_tanh_layer(h, cfg, p["w"])
    return jnp.transpose(h, (0, 3, 1, 2)).astype(jnp.float32)


# ---------------------------------------------------------------------------
if __name__ == "__main__":
    # Small shapes consistent with DCGAN_G: isize=16, nz=8, nc=3, ngf=8.
    isize, nz, nc, ngf = 16, 8, 3, 8
    batch = 2

    key = jax.random.PRNGKey(0)
    key, kx = jax.random.split(key)
    configs, weights = build_dcgan_g(key, isize, nz, nc, ngf, n_extra_layers=0)

    # DCGAN generator input: (B, nz, 1, 1) latent, NCHW (matches PyTorch).
    x = jax.random.normal(kx, (batch, nz, 1, 1), jnp.float32)

    fwd = jax.jit(functools.partial(dcgan_g_forward, configs))
    out = jax.block_until_ready(fwd(weights, x))

    assert out.shape == (batch, nc, isize, isize), out.shape
    assert out.dtype == jnp.float32
    assert bool(jnp.all(jnp.isfinite(out)))
    assert bool(jnp.all(jnp.abs(out) <= 1.0))   # tanh output range

    print("KERNEL_OK")
</pallas_src>

<mosaic_0001>
module attributes {stable_mosaic.version = 11 : i64} {
  func.func @_matmul_bnstats_kernel(%arg0: i32, %arg1: i32, %arg2: i32, %arg3: i32, %arg4: memref<1x32x128xbf16, #tpu.memory_space<vmem>>, %arg5: memref<1x128x128xbf16, #tpu.memory_space<vmem>>, %arg6: memref<1x32x128xf32, #tpu.memory_space<vmem>>, %arg7: memref<1x128xf32, #tpu.memory_space<vmem>>, %arg8: memref<1x128xf32, #tpu.memory_space<vmem>>, %arg9: memref<32x128xf32, #tpu.memory_space<vmem>>) attributes {dimension_semantics = [#tpu.dimension_semantics<parallel>, #tpu.dimension_semantics<arbitrary>, #tpu.dimension_semantics<arbitrary>, #tpu.dimension_semantics<arbitrary>], iteration_bounds = array<i64: 1, 1, 1, 1>, scalar_prefetch = 0 : i64, scratch_operands = 1 : i64, tpu.core_type = #tpu.core_type<tc>, window_params = [{transform_indices = @transform_0, window_bounds = array<i64: 1, 32, 128>}, {transform_indices = @transform_1, window_bounds = array<i64: 1, 128, 128>}, {transform_indices = @transform_2, window_bounds = array<i64: 1, 32, 128>}, {transform_indices = @transform_3, window_bounds = array<i64: 1, 128>}, {transform_indices = @transform_4, window_bounds = array<i64: 1, 128>}]} {
    %c0_i32 = arith.constant 0 : i32
    %0 = arith.cmpi eq, %arg3, %c0_i32 : i32
    %1 = arith.extui %0 : i1 to i32
    %c0_i32_0 = arith.constant 0 : i32
    %2 = arith.cmpi ne, %1, %c0_i32_0 : i32
    scf.if %2 {
      %cst_16 = arith.constant 0.000000e+00 : f32
      %21 = vector.broadcast %cst_16 : f32 to vector<32x128xf32>
      %c0_17 = arith.constant 0 : index
      %c0_18 = arith.constant 0 : index
      %22 = vector.load %arg9[%c0_17, %c0_18] : memref<32x128xf32, #tpu.memory_space<vmem>>, vector<32x128xf32>
      tpu.vector_store %arg9[%c0_17, %c0_18], %21 {strides = array<i32>} : memref<32x128xf32, #tpu.memory_space<vmem>>, vector<32x128xf32>,
    } else {
    }
    %c0_i32_1 = arith.constant 0 : i32
    %3 = arith.cmpi eq, %arg1, %c0_i32_1 : i32
    %c0_i32_2 = arith.constant 0 : i32
    %4 = arith.cmpi eq, %arg2, %c0_i32_2 : i32
    %5 = arith.andi %3, %4 : i1
    %c0_i32_3 = arith.constant 0 : i32
    %6 = arith.cmpi eq, %arg3, %c0_i32_3 : i32
    %7 = arith.andi %5, %6 : i1
    %8 = arith.extui %7 : i1 to i32
    %c0_i32_4 = arith.constant 0 : i32
    %9 = arith.cmpi ne, %8, %c0_i32_4 : i32
    scf.if %9 {
      %cst_16 = arith.constant 0.000000e+00 : f32
      %21 = vector.broadcast %cst_16 : f32 to vector<1x128xf32>
      %c0_17 = arith.constant 0 : index
      %c0_18 = arith.constant 0 : index
      %22 = vector.load %arg7[%c0_17, %c0_18] : memref<1x128xf32, #tpu.memory_space<vmem>>, vector<1x128xf32>
      tpu.vector_store %arg7[%c0_17, %c0_18], %21 {strides = array<i32>} : memref<1x128xf32, #tpu.memory_space<vmem>>, vector<1x128xf32>,
      %cst_19 = arith.constant 0.000000e+00 : f32
      %23 = vector.broadcast %cst_19 : f32 to vector<1x128xf32>
      %c0_20 = arith.constant 0 : index
      %c0_21 = arith.constant 0 : index
      %24 = vector.load %arg8[%c0_20, %c0_21] : memref<1x128xf32, #tpu.memory_space<vmem>>, vector<1x128xf32>
      tpu.vector_store %arg8[%c0_20, %c0_21], %23 {strides = array<i32>} : memref<1x128xf32, #tpu.memory_space<vmem>>, vector<1x128xf32>,
    } else {
    }
    %c0 = arith.constant 0 : index
    %c0_5 = arith.constant 0 : index
    %10 = vector.load %arg9[%c0, %c0_5] : memref<32x128xf32, #tpu.memory_space<vmem>>, vector<32x128xf32>
    %c0_6 = arith.constant 0 : index
    %c0_7 = arith.constant 0 : index
    %c0_8 = arith.constant 0 : index
    %11 = vector.load %arg4[%c0_6, %c0_7, %c0_8] : memref<1x32x128xbf16, #tpu.memory_space<vmem>>, vector<1x32x128xbf16>
    %12 = vector.shape_cast %11 : vector<1x32x128xbf16> to vector<32x128xbf16>
    %c0_9 = arith.constant 0 : index
    %c0_10 = arith.constant 0 : index
    %c0_11 = arith.constant 0 : index
    %13 = vector.load %arg5[%c0_9, %c0_10, %c0_11] : memref<1x128x128xbf16, #tpu.memory_space<vmem>>, vector<1x128x128xbf16>
    %14 = vector.shape_cast %13 : vector<1x128x128xbf16> to vector<128x128xbf16>
    %cst = arith.constant dense<0.000000e+00> : vector<32x128xf32>
    %15 = tpu.matmul %12, %14, %cst {dimension_numbers = #tpu.dot_dimension_numbers<[1], [0], [0], [1], [0, 0, 1, 1], [], []>} : vector<32x128xbf16>, vector<128x128xbf16>, vector<32x128xf32> -> vector<32x128xf32>
    %16 = arith.addf %10, %15 : vector<32x128xf32>
    %c0_12 = arith.constant 0 : index
    %c0_13 = arith.constant 0 : index
    %17 = vector.load %arg9[%c0_12, %c0_13] : memref<32x128xf32, #tpu.memory_space<vmem>>, vector<32x128xf32>
    tpu.vector_store %arg9[%c0_12, %c0_13], %16 {strides = array<i32>} : memref<32x128xf32, #tpu.memory_space<vmem>>, vector<32x128xf32>,
    %c0_i32_14 = arith.constant 0 : i32
    %18 = arith.cmpi eq, %arg3, %c0_i32_14 : i32
    %19 = arith.extui %18 : i1 to i32
    %c0_i32_15 = arith.constant 0 : i32
    %20 = arith.cmpi ne, %19, %c0_i32_15 : i32
    scf.if %20 {
      %c0_16 = arith.constant 0 : index
      %c0_17 = arith.constant 0 : index
      %21 = vector.load %arg9[%c0_16, %c0_17] : memref<32x128xf32, #tpu.memory_space<vmem>>, vector<32x128xf32>
      %c0_18 = arith.constant 0 : index
      %c0_19 = arith.constant 0 : index
      %c0_20 = arith.constant 0 : index
      %22 = vector.load %arg6[%c0_18, %c0_19, %c0_20] : memref<1x32x128xf32, #tpu.memory_space<vmem>>, vector<1x32x128xf32>
      %23 = vector.shape_cast %22 : vector<1x32x128xf32> to vector<32x128xf32>
      %24 = vector.shape_cast %21 : vector<32x128xf32> to vector<1x32x128xf32>
      tpu.vector_store %arg6[%c0_18, %c0_19, %c0_20], %24 {strides = array<i32>} : memref<1x32x128xf32, #tpu.memory_space<vmem>>, vector<1x32x128xf32>,
      %c0_21 = arith.constant 0 : index
      %c0_22 = arith.constant 0 : index
      %25 = vector.load %arg7[%c0_21, %c0_22] : memref<1x128xf32, #tpu.memory_space<vmem>>, vector<1x128xf32>
      %cst_23 = arith.constant dense<0.000000e+00> : vector<128xf32>
      %26 = vector.multi_reduction <add>, %21, %cst_23 [0] : vector<32x128xf32> to vector<128xf32>
      %27 = vector.shape_cast %26 : vector<128xf32> to vector<1x128xf32>
      %28 = arith.addf %25, %27 : vector<1x128xf32>
      %c0_24 = arith.constant 0 : index
      %c0_25 = arith.constant 0 : index
      %29 = vector.load %arg7[%c0_24, %c0_25] : memref<1x128xf32, #tpu.memory_space<vmem>>, vector<1x128xf32>
      tpu.vector_store %arg7[%c0_24, %c0_25], %28 {strides = array<i32>} : memref<1x128xf32, #tpu.memory_space<vmem>>, vector<1x128xf32>,
      %c0_26 = arith.constant 0 : index
      %c0_27 = arith.constant 0 : index
      %30 = vector.load %arg8[%c0_26, %c0_27] : memref<1x128xf32, #tpu.memory_space<vmem>>, vector<1x128xf32>
      %31 = arith.mulf %21, %21 : vector<32x128xf32>
      %cst_28 = arith.constant dense<0.000000e+00> : vector<128xf32>
      %32 = vector.multi_reduction <add>, %31, %cst_28 [0] : vector<32x128xf32> to vector<128xf32>
      %33 = vector.shape_cast %32 : vector<128xf32> to vector<1x128xf32>
      %34 = arith.addf %30, %33 : vector<1x128xf32>
      %c0_29 = arith.constant 0 : index
      %c0_30 = arith.constant 0 : index
      %35 = vector.load %arg8[%c0_29, %c0_30] : memref<1x128xf32, #tpu.memory_space<vmem>>, vector<1x128xf32>
      tpu.vector_store %arg8[%c0_29, %c0_30], %34 {strides = array<i32>} : memref<1x128xf32, #tpu.memory_space<vmem>>, vector<1x128xf32>,
    } else {
    }
    return
  }
  func.func @transform_0(%arg0: i32, %arg1: i32, %arg2: i32, %arg3: i32) -> (i32, i32, i32) {
    %c0_i32 = arith.constant 0 : i32
    return %arg1, %arg2, %arg3 : i32, i32, i32
  }
  func.func @transform_1(%arg0: i32, %arg1: i32, %arg2: i32, %arg3: i32) -> (i32, i32, i32) {
    %c0_i32 = arith.constant 0 : i32
    return %arg1, %arg3, %arg0 : i32, i32, i32
  }
  func.func @transform_2(%arg0: i32, %arg1: i32, %arg2: i32, %arg3: i32) -> (i32, i32, i32) {
    %c0_i32 = arith.constant 0 : i32
    return %arg1, %arg2, %arg0 : i32, i32, i32
  }
  func.func @transform_3(%arg0: i32, %arg1: i32, %arg2: i32, %arg3: i32) -> (i32, i32) {
    %c0_i32 = arith.constant 0 : i32
    %c0_i32_0 = arith.constant 0 : i32
    return %c0_i32, %arg0 : i32, i32
  }
  func.func @transform_4(%arg0: i32, %arg1: i32, %arg2: i32, %arg3: i32) -> (i32, i32) {
    %c0_i32 = arith.constant 0 : i32
    %c0_i32_0 = arith.constant 0 : i32
    return %c0_i32, %arg0 : i32, i32
  }
}

module attributes {stable_mosaic.version = 11 : i64} {
  func.func @_bn_relu_kernel(%arg0: i32, %arg1: i32, %arg2: memref<32x128xf32, #tpu.memory_space<vmem>>, %arg3: memref<1x128xf32, #tpu.memory_space<vmem>>, %arg4: memref<1x128xf32, #tpu.memory_space<vmem>>, %arg5: memref<32x128xbf16, #tpu.memory_space<vmem>>) attributes {dimension_semantics = [#tpu.dimension_semantics<parallel>, #tpu.dimension_semantics<parallel>], iteration_bounds = array<i64: 1, 1>, scalar_prefetch = 0 : i64, scratch_operands = 0 : i64, tpu.core_type = #tpu.core_type<tc>, window_params = [{transform_indices = @transform_0, window_bounds = array<i64: 32, 128>}, {transform_indices = @transform_1, window_bounds = array<i64: 1, 128>}, {transform_indices = @transform_2, window_bounds = array<i64: 1, 128>}, {transform_indices = @transform_3, window_bounds = array<i64: 32, 128>}]} {
    %c0 = arith.constant 0 : index
    %c0_0 = arith.constant 0 : index
    %0 = vector.load %arg2[%c0, %c0_0] : memref<32x128xf32, #tpu.memory_space<vmem>>, vector<32x128xf32>
    %c0_1 = arith.constant 0 : index
    %c0_2 = arith.constant 0 : index
    %1 = vector.load %arg3[%c0_1, %c0_2] : memref<1x128xf32, #tpu.memory_space<vmem>>, vector<1x128xf32>
    %2 = vector.broadcast %1 : vector<1x128xf32> to vector<32x128xf32>
    %3 = arith.mulf %0, %2 : vector<32x128xf32>
    %c0_3 = arith.constant 0 : index
    %c0_4 = arith.constant 0 : index
    %4 = vector.load %arg4[%c0_3, %c0_4] : memref<1x128xf32, #tpu.memory_space<vmem>>, vector<1x128xf32>
    %5 = vector.broadcast %4 : vector<1x128xf32> to vector<32x128xf32>
    %6 = arith.addf %3, %5 : vector<32x128xf32>
    %cst = arith.constant 0.000000e+00 : f32
    %7 = vector.broadcast %cst : f32 to vector<32x128xf32>
    %8 = arith.maximumf %6, %7 : vector<32x128xf32>
    %9 = arith.truncf %8 : vector<32x128xf32> to vector<32x128xbf16>
    %c0_5 = arith.constant 0 : index
    %c0_6 = arith.constant 0 : index
    %10 = vector.load %arg5[%c0_5, %c0_6] : memref<32x128xbf16, #tpu.memory_space<vmem>>, vector<32x128xbf16>
    tpu.vector_store %arg5[%c0_5, %c0_6], %9 {strides = array<i32>} : memref<32x128xbf16, #tpu.memory_space<vmem>>, vector<32x128xbf16>,
    return
  }
  func.func @transform_0(%arg0: i32, %arg1: i32) -> (i32, i32) {
    %c0_i32 = arith.constant 0 : i32
    return %arg0, %arg1 : i32, i32
  }
  func.func @transform_1(%arg0: i32, %arg1: i32) -> (i32, i32) {
    %c0_i32 = arith.constant 0 : i32
    %c0_i32_0 = arith.constant 0 : i32
    return %c0_i32, %arg1 : i32, i32
  }
  func.func @transform_2(%arg0: i32, %arg1: i32) -> (i32, i32) {
    %c0_i32 = arith.constant 0 : i32
    %c0_i32_0 = arith.constant 0 : i32
    return %c0_i32, %arg1 : i32, i32
  }
  func.func @transform_3(%arg0: i32, %arg1: i32) -> (i32, i32) {
    %c0_i32 = arith.constant 0 : i32
    return %arg0, %arg1 : i32, i32
  }
}

module attributes {stable_mosaic.version = 11 : i64} {
  func.func @_matmul_bnstats_kernel(%arg0: i32, %arg1: i32, %arg2: i32, %arg3: i32, %arg4: memref<1x32x128xbf16, #tpu.memory_space<vmem>>, %arg5: memref<1x128x128xbf16, #tpu.memory_space<vmem>>, %arg6: memref<1x32x128xf32, #tpu.memory_space<vmem>>, %arg7: memref<1x128xf32, #tpu.memory_space<vmem>>, %arg8: memref<1x128xf32, #tpu.memory_space<vmem>>, %arg9: memref<32x128xf32, #tpu.memory_space<vmem>>) attributes {dimension_semantics = [#tpu.dimension_semantics<parallel>, #tpu.dimension_semantics<arbitrary>, #tpu.dimension_semantics<arbitrary>, #tpu.dimension_semantics<arbitrary>], iteration_bounds = array<i64: 1, 4, 1, 1>, scalar_prefetch = 0 : i64, scratch_operands = 1 : i64, tpu.core_type = #tpu.core_type<tc>, window_params = [{transform_indices = @transform_0, window_bounds = array<i64: 1, 32, 128>}, {transform_indices = @transform_1, window_bounds = array<i64: 1, 128, 128>}, {transform_indices = @transform_2, window_bounds = array<i64: 1, 32, 128>}, {transform_indices = @transform_3, window_bounds = array<i64: 1, 128>}, {transform_indices = @transform_4, window_bounds = array<i64: 1, 128>}]} {
    %c0_i32 = arith.constant 0 : i32
    %0 = arith.cmpi eq, %arg3, %c0_i32 : i32
    %1 = arith.extui %0 : i1 to i32
    %c0_i32_0 = arith.constant 0 : i32
    %2 = arith.cmpi ne, %1, %c0_i32_0 : i32
    scf.if %2 {
      %cst_16 = arith.constant 0.000000e+00 : f32
      %21 = vector.broadcast %cst_16 : f32 to vector<32x128xf32>
      %c0_17 = arith.constant 0 : index
      %c0_18 = arith.constant 0 : index
      %22 = vector.load %arg9[%c0_17, %c0_18] : memref<32x128xf32, #tpu.memory_space<vmem>>, vector<32x128xf32>
      tpu.vector_store %arg9[%c0_17, %c0_18], %21 {strides = array<i32>} : memref<32x128xf32, #tpu.memory_space<vmem>>, vector<32x128xf32>,
    } else {
    }
    %c0_i32_1 = arith.constant 0 : i32
    %3 = arith.cmpi eq, %arg1, %c0_i32_1 : i32
    %c0_i32_2 = arith.constant 0 : i32
    %4 = arith.cmpi eq, %arg2, %c0_i32_2 : i32
    %5 = arith.andi %3, %4 : i1
    %c0_i32_3 = arith.constant 0 : i32
    %6 = arith.cmpi eq, %arg3, %c0_i32_3 : i32
    %7 = arith.andi %5, %6 : i1
    %8 = arith.extui %7 : i1 to i32
    %c0_i32_4 = arith.constant 0 : i32
    %9 = arith.cmpi ne, %8, %c0_i32_4 : i32
    scf.if %9 {
      %cst_16 = arith.constant 0.000000e+00 : f32
      %21 = vector.broadcast %cst_16 : f32 to vector<1x128xf32>
      %c0_17 = arith.constant 0 : index
      %c0_18 = arith.constant 0 : index
      %22 = vector.load %arg7[%c0_17, %c0_18] : memref<1x128xf32, #tpu.memory_space<vmem>>, vector<1x128xf32>
      tpu.vector_store %arg7[%c0_17, %c0_18], %21 {strides = array<i32>} : memref<1x128xf32, #tpu.memory_space<vmem>>, vector<1x128xf32>,
      %cst_19 = arith.constant 0.000000e+00 : f32
      %23 = vector.broadcast %cst_19 : f32 to vector<1x128xf32>
      %c0_20 = arith.constant 0 : index
      %c0_21 = arith.constant 0 : index
      %24 = vector.load %arg8[%c0_20, %c0_21] : memref<1x128xf32, #tpu.memory_space<vmem>>, vector<1x128xf32>
      tpu.vector_store %arg8[%c0_20, %c0_21], %23 {strides = array<i32>} : memref<1x128xf32, #tpu.memory_space<vmem>>, vector<1x128xf32>,
    } else {
    }
    %c0 = arith.constant 0 : index
    %c0_5 = arith.constant 0 : index
    %10 = vector.load %arg9[%c0, %c0_5] : memref<32x128xf32, #tpu.memory_space<vmem>>, vector<32x128xf32>
    %c0_6 = arith.constant 0 : index
    %c0_7 = arith.constant 0 : index
    %c0_8 = arith.constant 0 : index
    %11 = vector.load %arg4[%c0_6, %c0_7, %c0_8] : memref<1x32x128xbf16, #tpu.memory_space<vmem>>, vector<1x32x128xbf16>
    %12 = vector.shape_cast %11 : vector<1x32x128xbf16> to vector<32x128xbf16>
    %c0_9 = arith.constant 0 : index
    %c0_10 = arith.constant 0 : index
    %c0_11 = arith.constant 0 : index
    %13 = vector.load %arg5[%c0_9, %c0_10, %c0_11] : memref<1x128x128xbf16, #tpu.memory_space<vmem>>, vector<1x128x128xbf16>
    %14 = vector.shape_cast %13 : vector<1x128x128xbf16> to vector<128x128xbf16>
    %cst = arith.constant dense<0.000000e+00> : vector<32x128xf32>
    %15 = tpu.matmul %12, %14, %cst {dimension_numbers = #tpu.dot_dimension_numbers<[1], [0], [0], [1], [0, 0, 1, 1], [], []>} : vector<32x128xbf16>, vector<128x128xbf16>, vector<32x128xf32> -> vector<32x128xf32>
    %16 = arith.addf %10, %15 : vector<32x128xf32>
    %c0_12 = arith.constant 0 : index
    %c0_13 = arith.constant 0 : index
    %17 = vector.load %arg9[%c0_12, %c0_13] : memref<32x128xf32, #tpu.memory_space<vmem>>, vector<32x128xf32>
    tpu.vector_store %arg9[%c0_12, %c0_13], %16 {strides = array<i32>} : memref<32x128xf32, #tpu.memory_space<vmem>>, vector<32x128xf32>,
    %c0_i32_14 = arith.constant 0 : i32
    %18 = arith.cmpi eq, %arg3, %c0_i32_14 : i32
    %19 = arith.extui %18 : i1 to i32
    %c0_i32_15 = arith.constant 0 : i32
    %20 = arith.cmpi ne, %19, %c0_i32_15 : i32
    scf.if %20 {
      %c0_16 = arith.constant 0 : index
      %c0_17 = arith.constant 0 : index
      %21 = vector.load %arg9[%c0_16, %c0_17] : memref<32x128xf32, #tpu.memory_space<vmem>>, vector<32x128xf32>
      %c0_18 = arith.constant 0 : index
      %c0_19 = arith.constant 0 : index
      %c0_20 = arith.constant 0 : index
      %22 = vector.load %arg6[%c0_18, %c0_19, %c0_20] : memref<1x32x128xf32, #tpu.memory_space<vmem>>, vector<1x32x128xf32>
      %23 = vector.shape_cast %22 : vector<1x32x128xf32> to vector<32x128xf32>
      %24 = vector.shape_cast %21 : vector<32x128xf32> to vector<1x32x128xf32>
      tpu.vector_store %arg6[%c0_18, %c0_19, %c0_20], %24 {strides = array<i32>} : memref<1x32x128xf32, #tpu.memory_space<vmem>>, vector<1x32x128xf32>,
      %c0_21 = arith.constant 0 : index
      %c0_22 = arith.constant 0 : index
      %25 = vector.load %arg7[%c0_21, %c0_22] : memref<1x128xf32, #tpu.memory_space<vmem>>, vector<1x128xf32>
      %cst_23 = arith.constant dense<0.000000e+00> : vector<128xf32>
      %26 = vector.multi_reduction <add>, %21, %cst_23 [0] : vector<32x128xf32> to vector<128xf32>
      %27 = vector.shape_cast %26 : vector<128xf32> to vector<1x128xf32>
      %28 = arith.addf %25, %27 : vector<1x128xf32>
      %c0_24 = arith.constant 0 : index
      %c0_25 = arith.constant 0 : index
      %29 = vector.load %arg7[%c0_24, %c0_25] : memref<1x128xf32, #tpu.memory_space<vmem>>, vector<1x128xf32>
      tpu.vector_store %arg7[%c0_24, %c0_25], %28 {strides = array<i32>} : memref<1x128xf32, #tpu.memory_space<vmem>>, vector<1x128xf32>,
      %c0_26 = arith.constant 0 : index
      %c0_27 = arith.constant 0 : index
      %30 = vector.load %arg8[%c0_26, %c0_27] : memref<1x128xf32, #tpu.memory_space<vmem>>, vector<1x128xf32>
      %31 = arith.mulf %21, %21 : vector<32x128xf32>
      %cst_28 = arith.constant dense<0.000000e+00> : vector<128xf32>
      %32 = vector.multi_reduction <add>, %31, %cst_28 [0] : vector<32x128xf32> to vector<128xf32>
      %33 = vector.shape_cast %32 : vector<128xf32> to vector<1x128xf32>
      %34 = arith.addf %30, %33 : vector<1x128xf32>
      %c0_29 = arith.constant 0 : index
      %c0_30 = arith.constant 0 : index
      %35 = vector.load %arg8[%c0_29, %c0_30] : memref<1x128xf32, #tpu.memory_space<vmem>>, vector<1x128xf32>
      tpu.vector_store %arg8[%c0_29, %c0_30], %34 {strides = array<i32>} : memref<1x128xf32, #tpu.memory_space<vmem>>, vector<1x128xf32>,
    } else {
    }
    return
  }
  func.func @transform_0(%arg0: i32, %arg1: i32, %arg2: i32, %arg3: i32) -> (i32, i32, i32) {
    %c0_i32 = arith.constant 0 : i32
    return %arg1, %arg2, %arg3 : i32, i32, i32
  }
  func.func @transform_1(%arg0: i32, %arg1: i32, %arg2: i32, %arg3: i32) -> (i32, i32, i32) {
    %c0_i32 = arith.constant 0 : i32
    return %arg1, %arg3, %arg0 : i32, i32, i32
  }
  func.func @transform_2(%arg0: i32, %arg1: i32, %arg2: i32, %arg3: i32) -> (i32, i32, i32) {
    %c0_i32 = arith.constant 0 : i32
    return %arg1, %arg2, %arg0 : i32, i32, i32
  }
  func.func @transform_3(%arg0: i32, %arg1: i32, %arg2: i32, %arg3: i32) -> (i32, i32) {
    %c0_i32 = arith.constant 0 : i32
    %c0_i32_0 = arith.constant 0 : i32
    return %c0_i32, %arg0 : i32, i32
  }
  func.func @transform_4(%arg0: i32, %arg1: i32, %arg2: i32, %arg3: i32) -> (i32, i32) {
    %c0_i32 = arith.constant 0 : i32
    %c0_i32_0 = arith.constant 0 : i32
    return %c0_i32, %arg0 : i32, i32
  }
}

module attributes {stable_mosaic.version = 11 : i64} {
  func.func @_bn_relu_kernel(%arg0: i32, %arg1: i32, %arg2: memref<32x128xf32, #tpu.memory_space<vmem>>, %arg3: memref<1x128xf32, #tpu.memory_space<vmem>>, %arg4: memref<1x128xf32, #tpu.memory_space<vmem>>, %arg5: memref<32x128xbf16, #tpu.memory_space<vmem>>) attributes {dimension_semantics = [#tpu.dimension_semantics<parallel>, #tpu.dimension_semantics<parallel>], iteration_bounds = array<i64: 4, 1>, scalar_prefetch = 0 : i64, scratch_operands = 0 : i64, tpu.core_type = #tpu.core_type<tc>, window_params = [{transform_indices = @transform_0, window_bounds = array<i64: 32, 128>}, {transform_indices = @transform_1, window_bounds = array<i64: 1, 128>}, {transform_indices = @transform_2, window_bounds = array<i64: 1, 128>}, {transform_indices = @transform_3, window_bounds = array<i64: 32, 128>}]} {
    %c0 = arith.constant 0 : index
    %c0_0 = arith.constant 0 : index
    %0 = vector.load %arg2[%c0, %c0_0] : memref<32x128xf32, #tpu.memory_space<vmem>>, vector<32x128xf32>
    %c0_1 = arith.constant 0 : index
    %c0_2 = arith.constant 0 : index
    %1 = vector.load %arg3[%c0_1, %c0_2] : memref<1x128xf32, #tpu.memory_space<vmem>>, vector<1x128xf32>
    %2 = vector.broadcast %1 : vector<1x128xf32> to vector<32x128xf32>
    %3 = arith.mulf %0, %2 : vector<32x128xf32>
    %c0_3 = arith.constant 0 : index
    %c0_4 = arith.constant 0 : index
    %4 = vector.load %arg4[%c0_3, %c0_4] : memref<1x128xf32, #tpu.memory_space<vmem>>, vector<1x128xf32>
    %5 = vector.broadcast %4 : vector<1x128xf32> to vector<32x128xf32>
    %6 = arith.addf %3, %5 : vector<32x128xf32>
    %cst = arith.constant 0.000000e+00 : f32
    %7 = vector.broadcast %cst : f32 to vector<32x128xf32>
    %8 = arith.maximumf %6, %7 : vector<32x128xf32>
    %9 = arith.truncf %8 : vector<32x128xf32> to vector<32x128xbf16>
    %c0_5 = arith.constant 0 : index
    %c0_6 = arith.constant 0 : index
    %10 = vector.load %arg5[%c0_5, %c0_6] : memref<32x128xbf16, #tpu.memory_space<vmem>>, vector<32x128xbf16>
    tpu.vector_store %arg5[%c0_5, %c0_6], %9 {strides = array<i32>} : memref<32x128xbf16, #tpu.memory_space<vmem>>, vector<32x128xbf16>,
    return
  }
  func.func @transform_0(%arg0: i32, %arg1: i32) -> (i32, i32) {
    %c0_i32 = arith.constant 0 : i32
    return %arg0, %arg1 : i32, i32
  }
  func.func @transform_1(%arg0: i32, %arg1: i32) -> (i32, i32) {
    %c0_i32 = arith.constant 0 : i32
    %c0_i32_0 = arith.constant 0 : i32
    return %c0_i32, %arg1 : i32, i32
  }
  func.func @transform_2(%arg0: i32, %arg1: i32) -> (i32, i32) {
    %c0_i32 = arith.constant 0 : i32
    %c0_i32_0 = arith.constant 0 : i32
    return %c0_i32, %arg1 : i32, i32
  }
  func.func @transform_3(%arg0: i32, %arg1: i32) -> (i32, i32) {
    %c0_i32 = arith.constant 0 : i32
    return %arg0, %arg1 : i32, i32
  }
}

module attributes {stable_mosaic.version = 11 : i64} {
  func.func @_matmul_tanh_kernel(%arg0: i32, %arg1: i32, %arg2: i32, %arg3: i32, %arg4: memref<1x128x128xbf16, #tpu.memory_space<vmem>>, %arg5: memref<1x128x128xbf16, #tpu.memory_space<vmem>>, %arg6: memref<1x128x128xf32, #tpu.memory_space<vmem>>, %arg7: memref<128x128xf32, #tpu.memory_space<vmem>>) attributes {dimension_semantics = [#tpu.dimension_semantics<parallel>, #tpu.dimension_semantics<parallel>, #tpu.dimension_semantics<parallel>, #tpu.dimension_semantics<arbitrary>], iteration_bounds = array<i64: 4, 1, 1, 1>, scalar_prefetch = 0 : i64, scratch_operands = 1 : i64, tpu.core_type = #tpu.core_type<tc>, window_params = [{transform_indices = @transform_0, window_bounds = array<i64: 1, 128, 128>}, {transform_indices = @transform_1, window_bounds = array<i64: 1, 128, 128>}, {transform_indices = @transform_2, window_bounds = array<i64: 1, 128, 128>}]} {
    %c0_i32 = arith.constant 0 : i32
    %0 = arith.cmpi eq, %arg3, %c0_i32 : i32
    %1 = arith.extui %0 : i1 to i32
    %c0_i32_0 = arith.constant 0 : i32
    %2 = arith.cmpi ne, %1, %c0_i32_0 : i32
    scf.if %2 {
      %cst_12 = arith.constant 0.000000e+00 : f32
      %14 = vector.broadcast %cst_12 : f32 to vector<128x128xf32>
      %c0_13 = arith.constant 0 : index
      %c0_14 = arith.constant 0 : index
      %15 = vector.load %arg7[%c0_13, %c0_14] : memref<128x128xf32, #tpu.memory_space<vmem>>, vector<128x128xf32>
      tpu.vector_store %arg7[%c0_13, %c0_14], %14 {strides = array<i32>} : memref<128x128xf32, #tpu.memory_space<vmem>>, vector<128x128xf32>,
    } else {
    }
    %c0 = arith.constant 0 : index
    %c0_1 = arith.constant 0 : index
    %3 = vector.load %arg7[%c0, %c0_1] : memref<128x128xf32, #tpu.memory_space<vmem>>, vector<128x128xf32>
    %c0_2 = arith.constant 0 : index
    %c0_3 = arith.constant 0 : index
    %c0_4 = arith.constant 0 : index
    %4 = vector.load %arg4[%c0_2, %c0_3, %c0_4] : memref<1x128x128xbf16, #tpu.memory_space<vmem>>, vector<1x128x128xbf16>
    %5 = vector.shape_cast %4 : vector<1x128x128xbf16> to vector<128x128xbf16>
    %c0_5 = arith.constant 0 : index
    %c0_6 = arith.constant 0 : index
    %c0_7 = arith.constant 0 : index
    %6 = vector.load %arg5[%c0_5, %c0_6, %c0_7] : memref<1x128x128xbf16, #tpu.memory_space<vmem>>, vector<1x128x128xbf16>
    %7 = vector.shape_cast %6 : vector<1x128x128xbf16> to vector<128x128xbf16>
    %cst = arith.constant dense<0.000000e+00> : vector<128x128xf32>
    %8 = tpu.matmul %5, %7, %cst {dimension_numbers = #tpu.dot_dimension_numbers<[1], [0], [0], [1], [0, 0, 1, 1], [], []>} : vector<128x128xbf16>, vector<128x128xbf16>, vector<128x128xf32> -> vector<128x128xf32>
    %9 = arith.addf %3, %8 : vector<128x128xf32>
    %c0_8 = arith.constant 0 : index
    %c0_9 = arith.constant 0 : index
    %10 = vector.load %arg7[%c0_8, %c0_9] : memref<128x128xf32, #tpu.memory_space<vmem>>, vector<128x128xf32>
    tpu.vector_store %arg7[%c0_8, %c0_9], %9 {strides = array<i32>} : memref<128x128xf32, #tpu.memory_space<vmem>>, vector<128x128xf32>,
    %c0_i32_10 = arith.constant 0 : i32
    %11 = arith.cmpi eq, %arg3, %c0_i32_10 : i32
    %12 = arith.extui %11 : i1 to i32
    %c0_i32_11 = arith.constant 0 : i32
    %13 = arith.cmpi ne, %12, %c0_i32_11 : i32
    scf.if %13 {
      %c0_12 = arith.constant 0 : index
      %c0_13 = arith.constant 0 : index
      %14 = vector.load %arg7[%c0_12, %c0_13] : memref<128x128xf32, #tpu.memory_space<vmem>>, vector<128x128xf32>
      %15 = math.tanh %14 : vector<128x128xf32>
      %c0_14 = arith.constant 0 : index
      %c0_15 = arith.constant 0 : index
      %c0_16 = arith.constant 0 : index
      %16 = vector.load %arg6[%c0_14, %c0_15, %c0_16] : memref<1x128x128xf32, #tpu.memory_space<vmem>>, vector<1x128x128xf32>
      %17 = vector.shape_cast %16 : vector<1x128x128xf32> to vector<128x128xf32>
      %18 = vector.shape_cast %15 : vector<128x128xf32> to vector<1x128x128xf32>
      tpu.vector_store %arg6[%c0_14, %c0_15, %c0_16], %18 {strides = array<i32>} : memref<1x128x128xf32, #tpu.memory_space<vmem>>, vector<1x128x128xf32>,
    } else {
    }
    return
  }
  func.func @transform_0(%arg0: i32, %arg1: i32, %arg2: i32, %arg3: i32) -> (i32, i32, i32) {
    %c0_i32 = arith.constant 0 : i32
    return %arg0, %arg1, %arg3 : i32, i32, i32
  }
  func.func @transform_1(%arg0: i32, %arg1: i32, %arg2: i32, %arg3: i32) -> (i32, i32, i32) {
    %c0_i32 = arith.constant 0 : i32
    return %arg0, %arg3, %arg2 : i32, i32, i32
  }
  func.func @transform_2(%arg0: i32, %arg1: i32, %arg2: i32, %arg3: i32) -> (i32, i32, i32) {
    %c0_i32 = arith.constant 0 : i32
    return %arg0, %arg1, %arg2 : i32, i32, i32
  }
}

</mosaic_0001>

<bundles_post_ra>
// kernel: dcgan_g_forward.6
= control target key start
LH: loop header
LB: loop body
LE: loop exit
PB: predicated region body
PF: predicated region fallthrough
CT: control target
= control target key end

     0   :  { %s133_s0 = inlined_call_operand.vmem [shape: f32[32,128], index: 0, kind: input, shape index: {}]   ;;  %s134_s1 = inlined_call_operand.vmem [shape: f32[1,128], index: 1, kind: input, shape index: {}]   ;;  %s135_s2 = inlined_call_operand.vmem [shape: f32[1,128], index: 2, kind: input, shape index: {}]   ;;  %s136_s3 = inlined_call_operand.vmem [shape: bf16[32,128], index: 3, kind: output, shape index: {}]  }
   0x1   :  { %v14_v0 = vld [vmem:[%s133_s0] sm:$0xff]  ;;  %v15_v1 = vld [vmem:[%s133_s0 + $0x8] sm:$0xff]  ;;  %v16_v6 = vld [vmem:[%s133_s0 + $0x10] sm:$0xff] }
   0x2   :  { %v68_v2 = vld [vmem:[%s134_s1] ss:$0 sm:$0xff]  ;;  %v17_v7 = vld [vmem:[%s133_s0 + $0x18] sm:$0xff] }
   0x3   :  { %v25_v3 = vmul.f32 %v68_v2, %v14_v0  ;;  %v26_v4 = vmul.f32 %v68_v2, %v15_v1  ;;  %v69_v5 = vld [vmem:[%s135_s2] ss:$0 sm:$0xff]  ;;  %v27_v8 = vmul.f32 %v68_v2, %v16_v6  ;;  %v28_v9 = vmul.f32 %v68_v2, %v17_v7 }
   0x5   :  { %v36_v10 = vadd.f32 %v69_v5, %v25_v3  ;;  %v37_v11 = vadd.f32 %v69_v5, %v26_v4  ;;  %v38_v12 = vadd.f32 %v69_v5, %v27_v8  ;;  %v39_v13 = vadd.f32 %v69_v5, %v28_v9 }
   0x7   :  { %v40_v14 = vmax.f32 %v36_v10, 0.0  ;;  %v41_v15 = vmax.f32 %v37_v11, 0.0  ;;  %v42_v16 = vmax.f32 %v38_v12, 0.0  ;;  %v43_v17 = vmax.f32 %v39_v13, 0.0 }
   0x9   :  { %v81_v18 = vpack.c.bf16 %v41_v15, %v40_v14  ;;  %v86_v19 = vpack.c.bf16 %v43_v17, %v42_v16 }
   0xb   :  { %82 = vst [vmem:[%s136_s3] sm:$0xff] %v81_v18   ;;  %88 = vst [vmem:[%s136_s3 + $0x8] sm:$0xff] %v86_v19  }

// kernel: dcgan_g_forward.5
= control target key start
LH: loop header
LB: loop body
LE: loop exit
PB: predicated region body
PF: predicated region fallthrough
CT: control target
= control target key end

     0   :  { %v276_v10 = vmov 0.0   ;;  %s362_s1 = inlined_call_operand.vmem [shape: bf16[1,128,128], index: 1, kind: input, shape index: {}]   ;;  %s363_s0 = inlined_call_operand.vmem [shape: bf16[1,32,128], index: 0, kind: input, shape index: {}]   ;;  %s364_s3 = inlined_call_operand.vmem [shape: f32[1,128], index: 3, kind: output, shape index: {1}]   ;;  %s365_s4 = inlined_call_operand.vmem [shape: f32[1,128], index: 4, kind: output, shape index: {2}]   ;;  %s366_s2 = inlined_call_operand.vmem [shape: f32[1,32,128], index: 2, kind: output, shape index: {0}]  }
   0x1   :  { %v266_v0 = vld [vmem:[%s362_s1] sm:$0xff]   ;;  %v267_v1 = vld [vmem:[%s362_s1 + $0x8] sm:$0xff]   ;;  %v268_v2 = vld [vmem:[%s362_s1 + $0x10] sm:$0xff]   ;;  %31 = vst [vmem:[%s364_s3] sm:$0x1] %v276_v10 }
   0x2   :  { %245 = vmatprep.subr.bf16.mxu0 %v266_v0  ;;  %v269_v3 = vld [vmem:[%s362_s1 + $0x18] sm:$0xff]   ;;  %v274_v4 = vld [vmem:[%s363_s0] sm:$0xff]   ;;  %v271_v6 = vld [vmem:[%s362_s1 + $0x28] sm:$0xff]   ;;  %32 = vst [vmem:[%s365_s4] sm:$0x1] %v276_v10 }
   0x3   :  { %246 = vmatpush3.bf16.msra.mxu0 %v266_v0  ;;  %261 = vmatprep.mubr.bf16.mxu0 %v274_v4  ;;  %v270_v5 = vld [vmem:[%s362_s1 + $0x20] sm:$0xff]   ;;  %v272_v7 = vld [vmem:[%s362_s1 + $0x30] sm:$0xff]   ;;  %v273_v8 = vld [vmem:[%s362_s1 + $0x38] sm:$0xff]  }
   0x4   :  { %247 = vmatprep.subr.bf16.mxu0 %v267_v1  ;;  %v275_v9 = vld [vmem:[%s363_s0 + $0x8] sm:$0xff]  }
   0x7   :  { %248 = vmatpush3.bf16.msra.mxu0 %v267_v1 }
   0x8   :  { %249 = vmatprep.subr.bf16.mxu0 %v268_v2  ;;  %v185_v34 = vld [vmem:[%s364_s3] sm:$0x1] }
   0x9   :  { %v197_v37 = vld [vmem:[%s365_s4] sm:$0x1] }
   0xb   :  { %250 = vmatpush3.bf16.msra.mxu0 %v268_v2 }
   0xc   :  { %251 = vmatprep.subr.bf16.mxu0 %v269_v3 }
   0xf   :  { %252 = vmatpush3.bf16.msra.mxu0 %v269_v3 }
  0x10   :  { %253 = vmatprep.subr.bf16.mxu0 %v270_v5 }
  0x13   :  { %254 = vmatpush3.bf16.msra.mxu0 %v270_v5 }
  0x14   :  { %255 = vmatprep.subr.bf16.mxu0 %v271_v6 }
  0x17   :  { %256 = vmatpush3.bf16.msra.mxu0 %v271_v6 }
  0x18   :  { %257 = vmatprep.subr.bf16.mxu0 %v272_v7 }
  0x1b   :  { %258 = vmatpush3.bf16.msra.mxu0 %v272_v7 }
  0x1c   :  { %259 = vmatprep.subr.bf16.mxu0 %v273_v8 }
  0x1f   :  { %260 = vmatpush3.bf16.msra.mxu0 %v273_v8 }
  0x22   :  { %262 = vmatmul.mubr.bf16.vlgmr.msra.gmra.mrb[0].mxu0 %v275_v9 }
  0xf5   :  { %v263_v11 = vpop.f32.mrb[0].mxu0 }
  0xf6   :  { %183 = vst [vmem:[%s366_s2 + $0x10] sm:$0xff] %v263_v11  ;;  %v151_v12 = vpop.f32.mrb[1].mxu0  ;;  %v200_v18 = vmul.f32 %v263_v11, %v263_v11 }
  0xf7   :  { %181 = vst [vmem:[%s366_s2] sm:$0xff] %v151_v12  ;;  %v264_v13 = vpop.f32.mrb[2].mxu0  ;;  %v198_v15 = vmul.f32 %v151_v12, %v151_v12 }
  0xf8   :  { %184 = vst [vmem:[%s366_s2 + $0x18] sm:$0xff] %v264_v13  ;;  %v154_v14 = vpop.f32.mrb[3].mxu0  ;;  %v201_v21 = vmul.f32 %v264_v13, %v264_v13 }
  0xf9   :  { %182 = vst [vmem:[%s366_s2 + $0x8] sm:$0xff] %v154_v14  ;;  %v186_v16 = vadd.f32 %v154_v14, %v151_v12  ;;  %v199_v17 = vmul.f32 %v154_v14, %v154_v14 }
  0xfb   :  { %v187_v19 = vadd.f32 %v263_v11, %v186_v16  ;;  %v202_v20 = vadd.f32 %v199_v17, %v198_v15 }
  0xfd   :  { %v188_v22 = vadd.f32 %v264_v13, %v187_v19  ;;  %v203_v23 = vadd.f32 %v202_v20, %v200_v18 }
  0xff   :  { %v189_v24 = vrot.slane %v188_v22, 4  ;;  %v204_v25 = vadd.f32 %v203_v23, %v201_v21 }
 0x101   :  { %v190_v26 = vadd.f32 %v189_v24, %v188_v22  ;;  %v205_v27 = vrot.slane %v204_v25, 4 }
 0x103   :  { %v191_v28 = vrot.slane %v190_v26, 2  ;;  %v206_v29 = vadd.f32 %v205_v27, %v204_v25 }
 0x105   :  { %v192_v30 = vadd.f32 %v191_v28, %v190_v26  ;;  %v207_v31 = vrot.slane %v206_v29, 2 }
 0x107   :  { %v193_v32 = vrot.slane %v192_v30, 1  ;;  %v208_v33 = vadd.f32 %v207_v31, %v206_v29 }
 0x109   :  { %v194_v35 = vadd.f32 %v193_v32, %v192_v30  ;;  %v209_v36 = vrot.slane %v208_v33, 1 }
 0x10b   :  { %v195_v38 = vadd.f32 %v194_v35, %v185_v34  ;;  %v210_v39 = vadd.f32 %v209_v36, %v208_v33 }
 0x10d   :  { %196 = vst [vmem:[%s364_s3] sm:$0x1] %v195_v38  ;;  %v211_v40 = vadd.f32 %v210_v39, %v197_v37 }
 0x10f   :  { %212 = vst [vmem:[%s365_s4] sm:$0x1] %v211_v40 }

// kernel: dcgan_g_forward.8
= control target key start
LH: loop header
LB: loop body
LE: loop exit
PB: predicated region body
PF: predicated region fallthrough
CT: control target
= control target key end

     0   :  { %s487_s12 = smov 0   ;;  %s489_s13 = smov 0   ;;  %s526_s0 = inlined_call_operand.vmem [shape: f32[128,128], index: 0, kind: input, shape index: {}]   ;;  %s527_s1 = inlined_call_operand.vmem [shape: f32[1,128], index: 1, kind: input, shape index: {}]   ;;  %s528_s2 = inlined_call_operand.vmem [shape: f32[1,128], index: 2, kind: input, shape index: {}]   ;;  %s529_s3 = inlined_call_operand.vmem [shape: bf16[128,128], index: 3, kind: output, shape index: {}]  }
   0x1   :  { %s491_s14 = smov 0  }
   0x2 LB: > { %s25_s15 = sadd.s32 1, %s461_s13  ;;  %p391_p0 = scmp.ge.s32.totalorder %s465_s14, 1  ;;  %s465_s14 = sphi %s491_s14, %s13_s14   ;;  %s461_s13 = sphi %s489_s13, %s531_s13   ;;  %s457_s12 = sphi %s487_s12, %s530_s12  }
   0x3   : > { %p27_p1 = scmp.ge.s32.totalorder %s25_s15, 4  ;;  %p173_p2 = scmp.lt.s32.totalorder %s465_s14, 5 }
   0x5   : > { %s533_s15 = smov (%p27_p1, %s25_s15), 0  ;;  %p174_p3 = pnand %p391_p0, %p173_p2 }
   0x6   : > { %s392_s16 = sshll.u32 (!%p174_p3), %s457_s12, 2  ;;  %v396_v0 = vld [vmem:[%s527_s1] ss:$0 sm:$0xff] (!%p174_p3) }
   0x7   : > { %177 = sbr.rel (%p174_p3) target bundleno = 28 (0x1c), region = 32  ;;  %p210_p4 = scmp.lt.s32.totalorder (!%p174_p3), %s392_s16, 15  ;;  %v397_v1 = vld [vmem:[%s528_s2] ss:$0 sm:$0xff] (!%p174_p3) }
   0xe   : > { %s535_s16 = smov (!%p210_p4, %s392_s16), 15 }
   0xf   : > { %s393_s17 = sshll.u32 %s535_s16, 3  ;;  %s395_s25 = sshll.u32 %s535_s16, 2 }
  0x10   : > { %s216_s22 = scalar_lea.vmem %s526_s0, %s393_s17  ;;  %s231_s28 = scalar_lea.vmem %s529_s3, %s395_s25 }
  0x11   : > { %v233_v2 = vld [vmem:[%s216_s22] sm:$0xff]  ;;  %v234_v3 = vld [vmem:[%s216_s22 + $0x8] sm:$0xff]  ;;  %v235_v4 = vld [vmem:[%s216_s22 + $0x10] sm:$0xff] }
  0x12   : > { %v244_v5 = vmul.f32 %v396_v0, %v233_v2  ;;  %v245_v6 = vmul.f32 %v396_v0, %v234_v3  ;;  %v236_v7 = vld [vmem:[%s216_s22 + $0x18] sm:$0xff]  ;;  %v246_v8 = vmul.f32 %v396_v0, %v235_v4 }
  0x13   : > { %v247_v9 = vmul.f32 %v396_v0, %v236_v7 }
  0x14   : > { %v255_v10 = vadd.f32 %v397_v1, %v244_v5  ;;  %v256_v11 = vadd.f32 %v397_v1, %v245_v6  ;;  %v257_v12 = vadd.f32 %v397_v1, %v246_v8 }
  0x15   : > { %v258_v13 = vadd.f32 %v397_v1, %v247_v9 }
  0x16   : > { %v259_v14 = vmax.f32 %v255_v10, 0.0  ;;  %v260_v15 = vmax.f32 %v256_v11, 0.0  ;;  %v261_v16 = vmax.f32 %v257_v12, 0.0 }
  0x17   : > { %v262_v17 = vmax.f32 %v258_v13, 0.0 }
  0x18   : > { %v411_v18 = vpack.c.bf16 %v260_v15, %v259_v14 }
  0x19   : > { %v416_v19 = vpack.c.bf16 %v262_v17, %v261_v16 }
  0x1a   : > { %412 = vst [vmem:[%s231_s28] sm:$0xff] %v411_v18  }
  0x1b   : > { %418 = vst [vmem:[%s231_s28 + $0x8] sm:$0xff] %v416_v19  }
  0x1c PF: > { %s13_s14 = sadd.s32 1, %s465_s14   ;;  %s530_s12 = smov %s461_s13 }
  0x1d   : > { %p10_p5 = scmp.ge.s32.totalorder %s13_s14, 6   ;;  %s531_s13 = smov %s533_s15 }
  0x1f   :  { %12 = sbr.rel (!%p10_p5) target bundleno = 2 (0x2), region = 68 }

// kernel: dcgan_g_forward.7
= control target key start
LH: loop header
LB: loop body
LE: loop exit
PB: predicated region body
PF: predicated region fallthrough
CT: control target
= control target key end

     0   :  { %s853_s15 = smov 0   ;;  %s855_s16 = smov 0   ;;  %s917_s0 = inlined_call_operand.vmem [shape: bf16[4,32,128], index: 0, kind: input, shape index: {}]   ;;  %s918_s1 = inlined_call_operand.vmem [shape: bf16[4,128,128], index: 1, kind: input, shape index: {}]   ;;  %s919_s2 = inlined_call_operand.vmem [shape: f32[4,32,128], index: 2, kind: output, shape index: {0}]   ;;  %s920_s3 = inlined_call_operand.vmem [shape: f32[1,128], index: 3, kind: output, shape index: {1}]   ;;  %s921_s4 = inlined_call_operand.vmem [shape: f32[1,128], index: 4, kind: output, shape index: {2}]  }
   0x1   :  { %s857_s17 = smov 0  }
   0x2 LB: > { %s37_s18 = sadd.s32 1, %s820_s16  ;;  %p708_p0 = scmp.ge.s32.totalorder %s824_s17, 1  ;;  %s824_s17 = sphi %s857_s17, %s15_s17   ;;  %s820_s16 = sphi %s855_s16, %s923_s16   ;;  %s816_s15 = sphi %s853_s15, %s922_s15  }
   0x3   : > { %p39_p1 = scmp.ge.s32.totalorder %s37_s18, 4  ;;  %p231_p2 = scmp.lt.s32.totalorder %s824_s17, 5 }
   0x5   : > { %s925_s18 = smov (%p39_p1, %s37_s18), 0  ;;  %p232_p3 = pnand %p708_p0, %p231_p2 }
   0x6   : > { %p290_p4 = scmp.lt.s32.totalorder (!%p232_p3), %s816_s15, 3  ;;  %p343_p5 = scmp.eq.s32.totalorder (!%p232_p3), %s816_s15, 0  ;;  %v826_v0 = vmov (!%p232_p3), 0.0  }
   0x7   : > { %235 = sbr.rel (%p232_p3) target bundleno = 294 (0x126), region = 28  ;;  %339 = vst [vmem:[#allocation2] sm:$0xff] (!%p232_p3), %v826_v0  ;;  %340 = vst [vmem:[#allocation2 + $0x8] sm:$0xff] (!%p232_p3), %v826_v0 }
   0x8   : > { %341 = vst [vmem:[#allocation2 + $0x10] sm:$0xff] (!%p232_p3), %v826_v0  ;;  %342 = vst [vmem:[#allocation2 + $0x18] sm:$0xff] (!%p232_p3), %v826_v0 }
   0xe   : > { %s927_s15 = smov (!%p290_p4, %s816_s15), 3  ;;  %350 = sbr.rel (!%p343_p5) target bundleno = 21 (0x15), region = 36 }
   0xf   : > { %s731_s19 = sshll.u32 %s927_s15, 4  ;;  %s732_s20 = sshll.u32 %s927_s15, 6  ;;  %v827_v1 = vmov (%p343_p5), 0.0  }
  0x10   : > { %s874_s23 = scalar_lea.vmem %s917_s0, %s731_s19  ;;  %s313_s26 = scalar_lea.vmem %s918_s1, %s732_s20  ;;  %351 = vst [vmem:[%s920_s3] sm:$0x1] (%p343_p5), %v827_v1  ;;  %352 = vst [vmem:[%s921_s4] sm:$0x1] (%p343_p5), %v827_v1 }
  0x11   : > { %s733_s27 = sshll.u32 %s927_s15, 5 }
  0x12   : > { %s882_s30 = scalar_lea.vmem %s919_s2, %s733_s27 }
  0x15 PF: > { %v792_v2 = vld [vmem:[%s313_s26] sm:$0xff]   ;;  %v793_v3 = vld [vmem:[%s313_s26 + $0x8] sm:$0xff]   ;;  %v794_v4 = vld [vmem:[%s313_s26 + $0x10] sm:$0xff]  }
  0x16   : > { %746 = vmatprep.subr.bf16.mxu0 %v792_v2  ;;  %v795_v5 = vld [vmem:[%s313_s26 + $0x18] sm:$0xff]   ;;  %v800_v6 = vld [vmem:[%s874_s23] sm:$0xff]   ;;  %v797_v8 = vld [vmem:[%s313_s26 + $0x28] sm:$0xff]  }
  0x17   : > { %747 = vmatpush3.bf16.msra.mxu0 %v792_v2  ;;  %762 = vmatprep.mubr.bf16.mxu0 %v800_v6  ;;  %v796_v7 = vld [vmem:[%s313_s26 + $0x20] sm:$0xff]   ;;  %v798_v9 = vld [vmem:[%s313_s26 + $0x30] sm:$0xff]   ;;  %v799_v10 = vld [vmem:[%s313_s26 + $0x38] sm:$0xff]  }
  0x18   : > { %748 = vmatprep.subr.bf16.mxu0 %v793_v3  ;;  %v801_v11 = vld [vmem:[%s874_s23 + $0x8] sm:$0xff]   ;;  %v355_v12 = vld [vmem:[#allocation2 + $0x10] sm:$0xff]  ;;  %v353_v13 = vld [vmem:[#allocation2] sm:$0xff] }
  0x19   : > { %v356_v15 = vld [vmem:[#allocation2 + $0x18] sm:$0xff]  ;;  %v354_v18 = vld [vmem:[#allocation2 + $0x8] sm:$0xff]  ;;  %v505_v43 = vld [vmem:[%s920_s3] sm:$0x1] }
  0x1a   : > { %v517_v46 = vld [vmem:[%s921_s4] sm:$0x1] }
  0x1b   : > { %749 = vmatpush3.bf16.msra.mxu0 %v793_v3 }
  0x1c   : > { %750 = vmatprep.subr.bf16.mxu0 %v794_v4 }
  0x1f   : > { %751 = vmatpush3.bf16.msra.mxu0 %v794_v4 }
  0x20   : > { %752 = vmatprep.subr.bf16.mxu0 %v795_v5 }
  0x23   : > { %753 = vmatpush3.bf16.msra.mxu0 %v795_v5 }
  0x24   : > { %754 = vmatprep.subr.bf16.mxu0 %v796_v7 }
  0x27   : > { %755 = vmatpush3.bf16.msra.mxu0 %v796_v7 }
  0x28   : > { %756 = vmatprep.subr.bf16.mxu0 %v797_v8 }
  0x2b   : > { %757 = vmatpush3.bf16.msra.mxu0 %v797_v8 }
  0x2c   : > { %758 = vmatprep.subr.bf16.mxu0 %v798_v9 }
  0x2f   : > { %759 = vmatpush3.bf16.msra.mxu0 %v798_v9 }
  0x30   : > { %760 = vmatprep.subr.bf16.mxu0 %v799_v10 }
  0x33   : > { %761 = vmatpush3.bf16.msra.mxu0 %v799_v10 }
  0x36   : > { %763 = vmatmul.mubr.bf16.vlgmr.msra.gmra.mrb[0].mxu0 %v801_v11 }
 0x109   : > { %v764_v14 = vpop.f32.mrb[0].mxu0 }
 0x10a   : > { %v488_v16 = vadd.f32 %v764_v14, %v355_v12  ;;  %v471_v17 = vpop.f32.mrb[1].mxu0 }
 0x10b   : > { %v486_v19 = vadd.f32 %v471_v17, %v353_v13  ;;  %v765_v20 = vpop.f32.mrb[2].mxu0 }
 0x10c   : > { %492 = vst [vmem:[#allocation2 + $0x10] sm:$0xff] %v488_v16  ;;  %503 = vst [vmem:[%s882_s30 + $0x10] sm:$0xff] %v488_v16  ;;  %v489_v21 = vadd.f32 %v765_v20, %v356_v15  ;;  %v474_v22 = vpop.f32.mrb[3].mxu0  ;;  %v520_v27 = vmul.f32 %v488_v16, %v488_v16 }
 0x10d   : > { %490 = vst [vmem:[#allocation2] sm:$0xff] %v486_v19  ;;  %501 = vst [vmem:[%s882_s30] sm:$0xff] %v486_v19  ;;  %v487_v23 = vadd.f32 %v474_v22, %v354_v18  ;;  %v518_v24 = vmul.f32 %v486_v19, %v486_v19 }
 0x10e   : > { %493 = vst [vmem:[#allocation2 + $0x18] sm:$0xff] %v489_v21  ;;  %504 = vst [vmem:[%s882_s30 + $0x18] sm:$0xff] %v489_v21  ;;  %v521_v30 = vmul.f32 %v489_v21, %v489_v21 }
 0x10f   : > { %491 = vst [vmem:[#allocation2 + $0x8] sm:$0xff] %v487_v23  ;;  %502 = vst [vmem:[%s882_s30 + $0x8] sm:$0xff] %v487_v23  ;;  %v506_v25 = vadd.f32 %v487_v23, %v486_v19  ;;  %v519_v26 = vmul.f32 %v487_v23, %v487_v23 }
 0x111   : > { %v507_v28 = vadd.f32 %v506_v25, %v488_v16  ;;  %v522_v29 = vadd.f32 %v519_v26, %v518_v24 }
 0x113   : > { %v508_v31 = vadd.f32 %v507_v28, %v489_v21  ;;  %v523_v32 = vadd.f32 %v522_v29, %v520_v27 }
 0x115   : > { %v509_v33 = vrot.slane %v508_v31, 4  ;;  %v524_v34 = vadd.f32 %v523_v32, %v521_v30 }
 0x117   : > { %v510_v35 = vadd.f32 %v509_v33, %v508_v31  ;;  %v525_v36 = vrot.slane %v524_v34, 4 }
 0x119   : > { %v511_v37 = vrot.slane %v510_v35, 2  ;;  %v526_v38 = vadd.f32 %v525_v36, %v524_v34 }
 0x11b   : > { %v512_v39 = vadd.f32 %v511_v37, %v510_v35  ;;  %v527_v40 = vrot.slane %v526_v38, 2 }
 0x11d   : > { %v513_v41 = vrot.slane %v512_v39, 1  ;;  %v528_v42 = vadd.f32 %v527_v40, %v526_v38 }
 0x11f   : > { %v514_v44 = vadd.f32 %v513_v41, %v512_v39  ;;  %v529_v45 = vrot.slane %v528_v42, 1 }
 0x121   : > { %v515_v47 = vadd.f32 %v514_v44, %v505_v43  ;;  %v530_v48 = vadd.f32 %v529_v45, %v528_v42 }
 0x123   : > { %516 = vst [vmem:[%s920_s3] sm:$0x1] %v515_v47  ;;  %v531_v49 = vadd.f32 %v530_v48, %v517_v46 }
 0x125   : > { %532 = vst [vmem:[%s921_s4] sm:$0x1] %v531_v49 }
 0x126 PF: > { %s15_s17 = sadd.s32 1, %s824_s17   ;;  %s922_s15 = smov %s820_s16 }
 0x127   : > { %p12_p6 = scmp.ge.s32.totalorder %s15_s17, 6   ;;  %s923_s16 = smov %s925_s18 }
 0x129   :  { %14 = sbr.rel (!%p12_p6) target bundleno = 2 (0x2), region = 97 }

// kernel: dcgan_g_forward.9
= control target key start
LH: loop header
LB: loop body
LE: loop exit
PB: predicated region body
PF: predicated region fallthrough
CT: control target
= control target key end

     0   :  { %s942_s9 = smov 0   ;;  %s944_s10 = smov 0   ;;  %s1020_s0 = inlined_call_operand.vmem [shape: bf16[4,128,128], index: 0, kind: input, shape index: {}]   ;;  %s1021_s1 = inlined_call_operand.vmem [shape: bf16[4,128,128], index: 1, kind: input, shape index: {}]   ;;  %s1022_s2 = inlined_call_operand.vmem [shape: f32[4,128,128], index: 2, kind: output, shape index: {}]  }
   0x1   :  { %s946_s11 = smov 0  }
   0x2 LB: > { %s38_s12 = sadd.s32 1, %s921_s10  ;;  %p739_p0 = scmp.ge.s32.totalorder %s925_s11, 1  ;;  %s925_s11 = sphi %s946_s11, %s12_s11   ;;  %s921_s10 = sphi %s944_s10, %s1024_s10   ;;  %s917_s9 = sphi %s942_s9, %s1023_s9  }
   0x3   : > { %p40_p1 = scmp.ge.s32.totalorder %s38_s12, 4  ;;  %p176_p2 = scmp.lt.s32.totalorder %s925_s11, 5 }
   0x5   : > { %s1026_s12 = smov (%p40_p1, %s38_s12), 0  ;;  %p177_p3 = pnand %p739_p0, %p176_p2 }
   0x6   : > { %p225_p4 = scmp.lt.s32.totalorder (!%p177_p3), %s917_s9, 3 }
   0x7   : > { %180 = sbr.rel (%p177_p3) target bundleno = 289 (0x121), region = 28 }
   0xe   : > { %s1028_s9 = smov (!%p225_p4, %s917_s9), 3 }
   0xf   : > { %s764_s13 = sshll.u32 %s1028_s9, 6  ;;  %s766_s20 = sshll.u32 %s1028_s9, 7 }
  0x10   : > { %s966_s16 = scalar_lea.vmem %s1021_s1, %s764_s13  ;;  %s974_s19 = scalar_lea.vmem %s1020_s0, %s764_s13 }
  0x11   : > { %v855_v0 = vld [vmem:[%s966_s16] sm:$0xff]   ;;  %v856_v1 = vld [vmem:[%s966_s16 + $0x8] sm:$0xff]   ;;  %v857_v2 = vld [vmem:[%s966_s16 + $0x10] sm:$0xff]   ;;  %s993_s23 = scalar_lea.vmem %s1022_s2, %s766_s20 }
  0x12   : > { %783 = vmatprep.subr.bf16.mxu0 %v855_v0  ;;  %815 = vmatprep.subr.bf16.mxu1 %v855_v0  ;;  %v858_v3 = vld [vmem:[%s966_s16 + $0x18] sm:$0xff]   ;;  %v863_v4 = vld [vmem:[%s974_s19] sm:$0xff]   ;;  %v860_v7 = vld [vmem:[%s966_s16 + $0x28] sm:$0xff]  }
  0x13   : > { %784 = vmatpush3.bf16.msra.mxu0 %v855_v0  ;;  %823 = vmatpush3.bf16.msra.mxu1 %v855_v0  ;;  %v864_v5 = vld [vmem:[%s974_s19 + $0x20] sm:$0xff]   ;;  %v861_v8 = vld [vmem:[%s966_s16 + $0x30] sm:$0xff]   ;;  %v862_v9 = vld [vmem:[%s966_s16 + $0x38] sm:$0xff]  }
  0x14   : > { %785 = vmatprep.subr.bf16.mxu0 %v856_v1  ;;  %816 = vmatprep.subr.bf16.mxu1 %v856_v1  ;;  %v859_v6 = vld [vmem:[%s966_s16 + $0x20] sm:$0xff]   ;;  %v865_v10 = vld [vmem:[%s974_s19 + $0x8] sm:$0xff]   ;;  %v867_v12 = vld [vmem:[%s974_s19 + $0x10] sm:$0xff]  }
  0x15   : > { %799 = vmatprep.mubr.bf16.mxu0 %v863_v4  ;;  %807 = vmatprep.mubr.bf16.mxu1 %v864_v5  ;;  %v866_v11 = vld [vmem:[%s974_s19 + $0x28] sm:$0xff]   ;;  %v868_v13 = vld [vmem:[%s974_s19 + $0x30] sm:$0xff]   ;;  %v869_v14 = vld [vmem:[%s974_s19 + $0x18] sm:$0xff]  }
  0x16   : > { %v870_v15 = vld [vmem:[%s974_s19 + $0x38] sm:$0xff]  }
  0x17   : > { %786 = vmatpush3.bf16.msra.mxu0 %v856_v1  ;;  %824 = vmatpush3.bf16.msra.mxu1 %v856_v1 }
  0x18   : > { %787 = vmatprep.subr.bf16.mxu0 %v857_v2  ;;  %817 = vmatprep.subr.bf16.mxu1 %v857_v2 }
  0x1b   : > { %788 = vmatpush3.bf16.msra.mxu0 %v857_v2  ;;  %825 = vmatpush3.bf16.msra.mxu1 %v857_v2 }
  0x1c   : > { %789 = vmatprep.subr.bf16.mxu0 %v858_v3  ;;  %818 = vmatprep.subr.bf16.mxu1 %v858_v3 }
  0x1f   : > { %790 = vmatpush3.bf16.msra.mxu0 %v858_v3  ;;  %826 = vmatpush3.bf16.msra.mxu1 %v858_v3 }
  0x20   : > { %791 = vmatprep.subr.bf16.mxu0 %v859_v6  ;;  %819 = vmatprep.subr.bf16.mxu1 %v859_v6 }
  0x23   : > { %792 = vmatpush3.bf16.msra.mxu0 %v859_v6  ;;  %827 = vmatpush3.bf16.msra.mxu1 %v859_v6 }
  0x24   : > { %793 = vmatprep.subr.bf16.mxu0 %v860_v7  ;;  %820 = vmatprep.subr.bf16.mxu1 %v860_v7 }
  0x27   : > { %794 = vmatpush3.bf16.msra.mxu0 %v860_v7  ;;  %828 = vmatpush3.bf16.msra.mxu1 %v860_v7 }
  0x28   : > { %795 = vmatprep.subr.bf16.mxu0 %v861_v8  ;;  %821 = vmatprep.subr.bf16.mxu1 %v861_v8 }
  0x2b   : > { %796 = vmatpush3.bf16.msra.mxu0 %v861_v8  ;;  %829 = vmatpush3.bf16.msra.mxu1 %v861_v8 }
  0x2c   : > { %797 = vmatprep.subr.bf16.mxu0 %v862_v9  ;;  %822 = vmatprep.subr.bf16.mxu1 %v862_v9 }
  0x2f   : > { %798 = vmatpush3.bf16.msra.mxu0 %v862_v9  ;;  %830 = vmatpush3.bf16.msra.mxu1 %v862_v9 }
  0x32   : > { %800 = vmatmul.mubr.bf16.vlgmr.msra.gmra.mrb[0].mxu0 %v865_v10  ;;  %808 = vmatmul.mubr.bf16.vlgmr.msra.gmra.mrb[0].mxu1 %v866_v11 }
  0x33   : > { %803 = vmatprep.mubr.bf16.mxu0 %v867_v12  ;;  %811 = vmatprep.mubr.bf16.mxu1 %v868_v13 }
  0x3a   : > { %804 = vmatmul.mubr.bf16.gmra.mrb[4].mxu0 %v869_v14  ;;  %812 = vmatmul.mubr.bf16.gmra.mrb[4].mxu1 %v870_v15 }
 0x105   : > { %v801_v16 = vpop.f32.mrb[0].mxu0  ;;  %v809_v17 = vpop.f32.mrb[0].mxu1 }
 0x106   : > { %871 = vtanh.f32 %v801_v16  ;;  %v462_v18 = vpop.f32.mrb[1].mxu0  ;;  %v494_v19 = vpop.f32.mrb[1].mxu1 }
 0x107   : > { %873 = vtanh.f32 %v809_v17  ;;  %v802_v20 = vpop.f32.mrb[2].mxu0  ;;  %v810_v21 = vpop.f32.mrb[2].mxu1 }
 0x108   : > { %875 = vtanh.f32 %v462_v18  ;;  %v465_v22 = vpop.f32.mrb[3].mxu0  ;;  %v497_v23 = vpop.f32.mrb[3].mxu1 }
 0x109   : > { %877 = vtanh.f32 %v494_v19 }
 0x10a   : > { %879 = vtanh.f32 %v802_v20 }
 0x10b   : > { %881 = vtanh.f32 %v810_v21 }
 0x10c   : > { %883 = vtanh.f32 %v465_v22 }
 0x10d   : > { %885 = vtanh.f32 %v497_v23  ;;  %v805_v24 = vpop.f32.mrb[4].mxu0  ;;  %v813_v25 = vpop.f32.mrb[4].mxu1 }
 0x10e   : > { %887 = vtanh.f32 %v805_v24  ;;  %v478_v26 = vpop.f32.mrb[5].mxu0  ;;  %v510_v27 = vpop.f32.mrb[5].mxu1 }
 0x10f   : > { %889 = vtanh.f32 %v813_v25  ;;  %v806_v28 = vpop.f32.mrb[6].mxu0  ;;  %v814_v29 = vpop.f32.mrb[6].mxu1 }
 0x110   : > { %v872_v30 = vpop.eup %871  ;;  %891 = vtanh.f32 %v478_v26  ;;  %v481_v31 = vpop.f32.mrb[7].mxu0 }
 0x111   : > { %v513_v32 = vpop.f32.mrb[7].mxu1  ;;  %v874_v33 = vpop.eup %873  ;;  %594 = vst [vmem:[%s993_s23 + $0x10] sm:$0xff] %v872_v30  ;;  %893 = vtanh.f32 %v510_v27 }
 0x112   : > { %v876_v34 = vpop.eup %875  ;;  %602 = vst [vmem:[%s993_s23 + $0x50] sm:$0xff] %v874_v33  ;;  %895 = vtanh.f32 %v806_v28 }
 0x113   : > { %v878_v35 = vpop.eup %877  ;;  %592 = vst [vmem:[%s993_s23] sm:$0xff] %v876_v34  ;;  %897 = vtanh.f32 %v814_v29 }
 0x114   : > { %v880_v36 = vpop.eup %879  ;;  %600 = vst [vmem:[%s993_s23 + $0x40] sm:$0xff] %v878_v35  ;;  %899 = vtanh.f32 %v481_v31 }
 0x115   : > { %v882_v37 = vpop.eup %881  ;;  %595 = vst [vmem:[%s993_s23 + $0x18] sm:$0xff] %v880_v36  ;;  %901 = vtanh.f32 %v513_v32 }
 0x116   : > { %v884_v38 = vpop.eup %883  ;;  %603 = vst [vmem:[%s993_s23 + $0x58] sm:$0xff] %v882_v37 }
 0x117   : > { %v886_v39 = vpop.eup %885  ;;  %593 = vst [vmem:[%s993_s23 + $0x8] sm:$0xff] %v884_v38 }
 0x118   : > { %v888_v40 = vpop.eup %887  ;;  %601 = vst [vmem:[%s993_s23 + $0x48] sm:$0xff] %v886_v39 }
 0x119   : > { %v890_v41 = vpop.eup %889  ;;  %598 = vst [vmem:[%s993_s23 + $0x30] sm:$0xff] %v888_v40 }
 0x11a   : > { %v892_v42 = vpop.eup %891  ;;  %606 = vst [vmem:[%s993_s23 + $0x70] sm:$0xff] %v890_v41 }
 0x11b   : > { %v894_v43 = vpop.eup %893  ;;  %596 = vst [vmem:[%s993_s23 + $0x20] sm:$0xff] %v892_v42 }
 0x11c   : > { %v896_v44 = vpop.eup %895  ;;  %604 = vst [vmem:[%s993_s23 + $0x60] sm:$0xff] %v894_v43 }
 0x11d   : > { %v898_v45 = vpop.eup %897  ;;  %599 = vst [vmem:[%s993_s23 + $0x38] sm:$0xff] %v896_v44 }
 0x11e   : > { %v900_v46 = vpop.eup %899  ;;  %607 = vst [vmem:[%s993_s23 + $0x78] sm:$0xff] %v898_v45 }
 0x11f   : > { %v902_v47 = vpop.eup %901  ;;  %597 = vst [vmem:[%s993_s23 + $0x28] sm:$0xff] %v900_v46 }
 0x120   : > { %605 = vst [vmem:[%s993_s23 + $0x68] sm:$0xff] %v902_v47 }
 0x121 PF: > { %s12_s11 = sadd.s32 1, %s925_s11   ;;  %s1023_s9 = smov %s921_s10 }
 0x122   : > { %p9_p5 = scmp.ge.s32.totalorder %s12_s11, 6   ;;  %s1024_s10 = smov %s1026_s12 }
 0x124   :  { %11 = sbr.rel (!%p9_p5) target bundleno = 2 (0x2), region = 69 }

</bundles_post_ra>
